<compile_context>
chip_gen: v5e
topology: v5e:2x2
jax: 0.10.0
libtpu: 0.0.40
codegen_flags: <defaults>
</compile_context>

<pallas_src>
import jax
import jax.numpy as jnp
from jax.experimental import pallas as pl
from jax.experimental.pallas import tpu as pltpu


def _round_up(x, m):
    return (x + m - 1) // m * m


_VMEM_BUDGET = 36 * 1024 * 1024   # per-step working-set target (fits v7x's 64 MiB)
_VMEM_LIMIT = 48 * 1024 * 1024    # scoped-VMEM limit passed to Mosaic


# --------------------------------------------------------------- kernels ----

def _mlc_rowdot_kernel(x_ref, w_ref, b_ref, o_ref):
    """classes == 1 path: per-row dot on the VPU (MXU N=1 would be >=99% pad).

    x_ref: (TB, F) VMEM  - streamed, one tile per grid step
    w_ref: (1, F)  VMEM  - constant index_map => fetched once
    b_ref: (1,)    SMEM  - scalar bias
    o_ref: (TB, 1) VMEM
    """
    tb, F = x_ref.shape
    CH = 128
    n_chunks, rem = divmod(F, CH)

    # Accumulate 128-lane chunks into a (tb, 128) f32 tile; lane-reduce once at
    # the end.  Avoids materializing a (tb, F) f32 x*w temp in VMEM.
    acc = jnp.zeros((tb, CH), jnp.float32)
    for c in range(n_chunks):                                   # static slices
        xc = x_ref[:, c * CH:(c + 1) * CH].astype(jnp.float32)
        wc = w_ref[:, c * CH:(c + 1) * CH].astype(jnp.float32)
        acc = acc + xc * wc
    s = jnp.sum(acc, axis=-1, keepdims=True)                    # (tb, 1)
    if rem:
        xr = x_ref[:, n_chunks * CH:].astype(jnp.float32)
        wr = w_ref[:, n_chunks * CH:].astype(jnp.float32)
        s = s + jnp.sum(xr * wr, axis=-1, keepdims=True)
    o_ref[...] = (s + b_ref[0]).astype(o_ref.dtype)


def _mlc_matmul_kernel(x_ref, w_ref, b_ref, o_ref):
    """classes > 1 path: (TB, F) @ (F, C) on the MXU, unpadded (TB, C) output.

    w_ref/b_ref have constant index_maps => DMA'd once across the batch grid.
    """
    acc = jnp.dot(x_ref[...], w_ref[...],
                  preferred_element_type=jnp.float32,
                  precision=jax.lax.Precision.HIGHEST)
    o_ref[...] = (acc + b_ref[...].astype(jnp.float32)).astype(o_ref.dtype)


# --------------------------------------------------------------- wrapper ----

def _pick_batch_tile(B, F, C, x_item, w_item, o_item, max_tile):
    """Multiple-of-8 batch tile: balanced (even) step count, VMEM-budgeted."""
    max_tile = max(8, (max_tile // 8) * 8)
    n_steps = pl.cdiv(B, max_tile)
    if B > 256:
        n_steps = max(2, n_steps)          # give v7x's two TCs a half each
    if n_steps > 1 and n_steps % 2:
        n_steps += 1                       # even step count -> balanced megacore split
    tb = _round_up(pl.cdiv(B, n_steps), 8)

    # Shrink until the double-buffered per-step working set fits the budget.
    Fp = _round_up(F, 128)
    Cp = _round_up(max(C, 1), 128)

    def step_bytes(t):
        return (2 * t * Fp * x_item        # streamed x tile, double-buffered
                + Fp * Cp * w_item         # weight (+ bias), fetched once
                + 2 * t * Cp * o_item)     # output tile, double-buffered

    while tb > 8 and step_bytes(tb) > _VMEM_BUDGET:
        tb = max(8, _round_up(tb // 2, 8))

    if tb >= B:
        tb = B                             # single full-dim block: no masking
    return tb


def mlc_forward(avg_features, weight, bias, *, batch_tile=1024):
    """preds = avg_features @ weight.T + bias   (same semantics as nn.Linear).

    avg_features: (B, F); weight: (C, F); bias: (C,).
    """
    B, F = avg_features.shape
    C = weight.shape[0]
    dtype = avg_features.dtype

    x_item = jnp.dtype(avg_features.dtype).itemsize
    w_item = jnp.dtype(weight.dtype).itemsize
    o_item = jnp.dtype(dtype).itemsize

    tb = _pick_batch_tile(B, F, C, x_item, w_item, o_item, batch_tile)
    grid = (pl.cdiv(B, tb),)

    cost = pl.CostEstimate(
        flops=2 * B * F * C,
        bytes_accessed=int(avg_features.size) * x_item
        + int(weight.size) * w_item
        + int(bias.size) * jnp.dtype(bias.dtype).itemsize
        + B * C * o_item,
        transcendentals=0,
    )
    cparams = pltpu.CompilerParams(
        dimension_semantics=("parallel",),   # independent row tiles -> 2 TCs on v7x
        vmem_limit_bytes=_VMEM_LIMIT,
    )
    # TODO(synk): add a trailing "arbitrary" F-reduction grid axis (f32 VMEM
    # accumulator + pl.when init/finalize) once F outgrows the VMEM budget
    # (needed at roughly half the F on v7x vs v6e), and a class-tile axis for
    # very large C.
    # TODO(synk): callers that tolerate bf16 activations should pass x/weight
    # in bf16 (f32 accumulation is kept) — the kernel is HBM-bound on x, so
    # halving x bytes is a ~2x end-to-end lever on every TPU generation.

    if C == 1:
        # Mem-bound streaming row-dot: skip the MXU (N=1 would be >=99% padding).
        return pl.pallas_call(
            _mlc_rowdot_kernel,
            out_shape=jax.ShapeDtypeStruct((B, 1), dtype),
            grid=grid,
            in_specs=[
                pl.BlockSpec((tb, F), lambda i: (i, 0)),             # x: streamed
                pl.BlockSpec((1, F), lambda i: (0, 0)),              # w: fetched once
                pl.BlockSpec(memory_space=pltpu.MemorySpace.SMEM),   # bias scalar
            ],
            out_specs=pl.BlockSpec((tb, 1), lambda i: (i, 0)),
            compiler_params=cparams,
            cost_estimate=cost,
        )(avg_features, weight.reshape(1, F), bias.reshape(1))

    # General C: unpadded (B, C) output (narrow masked stores are <<1% of HBM
    # traffic); only a cheap weight transpose remains wrapper-side.
    w_t = weight.T                       # (F, C); cache outside for repeated calls
    b_row = bias.reshape(1, C)

    return pl.pallas_call(
        _mlc_matmul_kernel,
        out_shape=jax.ShapeDtypeStruct((B, C), dtype),
        grid=grid,
        in_specs=[
            pl.BlockSpec((tb, F), lambda i: (i, 0)),     # x: streamed per step
            pl.BlockSpec((F, C), lambda i: (0, 0)),      # weight: fetched once
            pl.BlockSpec((1, C), lambda i: (0, 0)),      # bias: fetched once
        ],
        out_specs=pl.BlockSpec((tb, C), lambda i: (i, 0)),
        compiler_params=cparams,
        cost_estimate=cost,
    )(avg_features, w_t, b_row)


def init_mlc_params(key, classes=1, fc_in_features=2048, dtype=jnp.float32):
    # Matches MLC.__init_weight: weight ~ U(-0.1, 0.1), bias = 0.
    w = jax.random.uniform(key, (classes, fc_in_features),
                           minval=-0.1, maxval=0.1, dtype=dtype)
    b = jnp.zeros((classes,), dtype=dtype)
    return w, b


if __name__ == "__main__":
    key = jax.random.PRNGKey(0)
    k_x1, k_w1, k_x2, k_w2, k_x3, k_w3 = jax.random.split(key, 6)

    # ---- default MLC config (classes=1): VPU row-dot path -------------------
    # Small batch_tile forces a multi-step balanced grid with a partial last
    # block; F=320 exercises both the 128-lane chunk loop and the remainder.
    B1, F1, C1 = 300, 320, 1
    x1 = jax.random.normal(k_x1, (B1, F1), dtype=jnp.float32)
    w1, _ = init_mlc_params(k_w1, classes=C1, fc_in_features=F1)
    b1 = jnp.full((C1,), 0.25, dtype=jnp.float32)    # nonzero bias to test the add
    out1 = jax.block_until_ready(mlc_forward(x1, w1, b1, batch_tile=128))
    ref1 = x1 @ w1.T + b1
    assert out1.shape == (B1, C1)
    assert jnp.allclose(out1, ref1, atol=1e-4, rtol=1e-5), "C=1 path mismatch"

    # ---- multi-class config: MXU path, unpadded narrow output, B < 128 ------
    B2, F2, C2 = 37, 128, 4
    x2 = jax.random.normal(k_x2, (B2, F2), dtype=jnp.float32)
    w2, _ = init_mlc_params(k_w2, classes=C2, fc_in_features=F2)
    b2 = jnp.linspace(-0.5, 0.5, C2, dtype=jnp.float32)
    out2 = jax.block_until_ready(mlc_forward(x2, w2, b2))
    ref2 = x2 @ w2.T + b2
    assert out2.shape == (B2, C2)
    assert jnp.allclose(out2, ref2, atol=1e-4, rtol=1e-5), "C>1 path mismatch"

    # ---- classes=1 with F < 128: remainder-only chunk path ------------------
    B3, F3, C3 = 16, 96, 1
    x3 = jax.random.normal(k_x3, (B3, F3), dtype=jnp.float32)
    w3, b3 = init_mlc_params(k_w3, classes=C3, fc_in_features=F3)
    out3 = jax.block_until_ready(mlc_forward(x3, w3, b3))
    ref3 = x3 @ w3.T + b3
    assert out3.shape == (B3, C3)
    assert jnp.allclose(out3, ref3, atol=1e-4, rtol=1e-5), "F<128 path mismatch"

    print("KERNEL_OK")
</pallas_src>

<mosaic_0001>
module attributes {stable_mosaic.version = 11 : i64} {
  func.func @_mlc_rowdot_kernel(%arg0: i32, %arg1: memref<80x320xf32, #tpu.memory_space<vmem>>, %arg2: memref<1x320xf32, #tpu.memory_space<vmem>>, %arg3: memref<1xf32, #tpu.memory_space<smem>>, %arg4: memref<80x1xf32, #tpu.memory_space<vmem>>) attributes {dimension_semantics = [#tpu.dimension_semantics<parallel>], iteration_bounds = array<i64: 4>, scalar_prefetch = 0 : i64, scratch_operands = 0 : i64, tpu.core_type = #tpu.core_type<tc>, window_params = [{transform_indices = @transform_0, window_bounds = array<i64: 80, 320>}, {pipeline_mode = #tpu.pipeline_mode<synchronous>, transform_indices = @transform_1, window_bounds = array<i64: 1, 320>}, {transform_indices = @transform_2, window_bounds = array<i64: 1>}, {transform_indices = @transform_3, window_bounds = array<i64: 80, 1>}]} {
    %cst = arith.constant 0.000000e+00 : f32
    %0 = vector.broadcast %cst : f32 to vector<80x128xf32>
    %c0 = arith.constant 0 : index
    %c0_0 = arith.constant 0 : index
    %1 = vector.load %arg1[%c0, %c0_0] : memref<80x320xf32, #tpu.memory_space<vmem>>, vector<80x128xf32>
    %c0_1 = arith.constant 0 : index
    %c0_2 = arith.constant 0 : index
    %2 = vector.load %arg2[%c0_1, %c0_2] : memref<1x320xf32, #tpu.memory_space<vmem>>, vector<1x128xf32>
    %3 = vector.broadcast %2 : vector<1x128xf32> to vector<80x128xf32>
    %4 = arith.mulf %1, %3 : vector<80x128xf32>
    %5 = arith.addf %0, %4 : vector<80x128xf32>
    %c0_3 = arith.constant 0 : index
    %c128 = arith.constant 128 : index
    %6 = vector.load %arg1[%c0_3, %c128] : memref<80x320xf32, #tpu.memory_space<vmem>>, vector<80x128xf32>
    %c0_4 = arith.constant 0 : index
    %c128_5 = arith.constant 128 : index
    %7 = vector.load %arg2[%c0_4, %c128_5] : memref<1x320xf32, #tpu.memory_space<vmem>>, vector<1x128xf32>
    %8 = vector.broadcast %7 : vector<1x128xf32> to vector<80x128xf32>
    %9 = arith.mulf %6, %8 : vector<80x128xf32>
    %10 = arith.addf %5, %9 : vector<80x128xf32>
    %cst_6 = arith.constant dense<0.000000e+00> : vector<80xf32>
    %11 = vector.multi_reduction <add>, %10, %cst_6 [1] : vector<80x128xf32> to vector<80xf32>
    %12 = vector.shape_cast %11 : vector<80xf32> to vector<80x1xf32>
    %c0_7 = arith.constant 0 : index
    %c256 = arith.constant 256 : index
    %13 = vector.load %arg1[%c0_7, %c256] : memref<80x320xf32, #tpu.memory_space<vmem>>, vector<80x64xf32>
    %c0_8 = arith.constant 0 : index
    %c256_9 = arith.constant 256 : index
    %14 = vector.load %arg2[%c0_8, %c256_9] : memref<1x320xf32, #tpu.memory_space<vmem>>, vector<1x64xf32>
    %15 = vector.broadcast %14 : vector<1x64xf32> to vector<80x64xf32>
    %16 = arith.mulf %13, %15 : vector<80x64xf32>
    %cst_10 = arith.constant dense<0.000000e+00> : vector<80xf32>
    %17 = vector.multi_reduction <add>, %16, %cst_10 [1] : vector<80x64xf32> to vector<80xf32>
    %18 = vector.shape_cast %17 : vector<80xf32> to vector<80x1xf32>
    %19 = arith.addf %12, %18 : vector<80x1xf32>
    %c0_11 = arith.constant 0 : index
    %20 = memref.load %arg3[%c0_11] : memref<1xf32, #tpu.memory_space<smem>>
    %21 = vector.broadcast %20 : f32 to vector<80x1xf32>
    %22 = arith.addf %19, %21 : vector<80x1xf32>
    %c0_12 = arith.constant 0 : index
    %c0_13 = arith.constant 0 : index
    %23 = vector.load %arg4[%c0_12, %c0_13] : memref<80x1xf32, #tpu.memory_space<vmem>>, vector<80x1xf32>
    tpu.vector_store %arg4[%c0_12, %c0_13], %22 {strides = array<i32>} : memref<80x1xf32, #tpu.memory_space<vmem>>, vector<80x1xf32>,
    return
  }
  func.func @transform_0(%arg0: i32) -> (i32, i32) {
    %c0_i32 = arith.constant 0 : i32
    %c0_i32_0 = arith.constant 0 : i32
    return %arg0, %c0_i32 : i32, i32
  }
  func.func @transform_1(%arg0: i32) -> (i32, i32) {
    %c0_i32 = arith.constant 0 : i32
    %c0_i32_0 = arith.constant 0 : i32
    %c0_i32_1 = arith.constant 0 : i32
    return %c0_i32, %c0_i32_0 : i32, i32
  }
  func.func @transform_2(%arg0: i32) -> i32 {
    %c0_i32 = arith.constant 0 : i32
    %c0_i32_0 = arith.constant 0 : i32
    return %c0_i32 : i32
  }
  func.func @transform_3(%arg0: i32) -> (i32, i32) {
    %c0_i32 = arith.constant 0 : i32
    %c0_i32_0 = arith.constant 0 : i32
    return %arg0, %c0_i32 : i32, i32
  }
}

</mosaic_0001>

<bundles_post_ra>
// kernel: tpu_custom_call.1
= control target key start
LH: loop header
LB: loop body
LE: loop exit
PB: predicated region body
PF: predicated region fallthrough
CT: control target
= control target key end

     0   :  { %s1277_s0 = inlined_call_operand.hbm [shape: f32[300,320], index: 0, kind: input, shape index: {}]   ;;  %s1278_s1 = inlined_call_operand.hbm [shape: f32[1,320], index: 1, kind: input, shape index: {}]   ;;  %s1279_s2 = inlined_call_operand.<no memory space> [shape: f32[1], index: 2, kind: input, shape index: {}]   ;;  %s1280_s3 = inlined_call_operand.vmem [shape: f32[300,1], index: 3, kind: output, shape index: {}]  }
   0x1   :  { %8 = sst [smem:[#allocation2]] %s1279_s2 }
   0x2   :  { %9 = vsyncpa [#allocation4], 0 }
   0x3   :  { %11 = vsyncpa [#allocation4 + $0x1], 0 }
   0x4   :  { %12 = vsyncpa [#allocation6], 0  ;;  %s1023_s14 = smov 0   ;;  %s1025_s15 = smov 0  }
   0x5   :  { %s1027_s16 = smov 0   ;;  %s1029_s17 = smov 0  }
   0x6 LB: > { %s1042_s2 = sadd.s32 4294967295, %s962_s17   ;;  %s1045_s18 = sadd.s32 1, %s962_s17   ;;  %s962_s17 = sphi %s1029_s17, %s1296_s17   ;;  %s958_s16 = sphi %s1027_s16, %s1295_s16   ;;  %s954_s15 = sphi %s1025_s15, %s1294_s15   ;;  %s950_s14 = sphi %s1023_s14, %s1293_s14  }
   0x7   : > { %s22_s19 = ssub.s32 %s962_s17, %s1045_s18  ;;  %s25_s20 = sadd.s32 1, %s958_s16 }
   0x8   : > { %p23_p0 = scmp.eq.s32.totalorder %s22_s19, 0  ;;  %p32_p1 = scmp.ne.s32.totalorder %s958_s16, %s954_s15 }
   0x9   : > { %p33_p2 = scmp.eq.s32.totalorder %s962_s17, 0  ;;  %p38_p3 = scmp.ne.s32.totalorder %s954_s15, %s950_s14 }
   0xa   : > { %s1055_s21 = scalar_select %p23_p0, %s958_s16, %s25_s20  }
   0xb   : > { %p1057_p4 = por %p33_p2, %p32_p1  ;;  %p1281_p5 = scmp.eq.s32.totalorder %s1042_s2, 0 }
   0xc   : > { %p104_p6 = scmp.eq.s32.totalorder %s1042_s2, 3  ;;  %p675_p7 = scmp.ge.s32.totalorder %s962_s17, 1 }
   0xd   : > { %p1066_p8 = por %p1281_p5, %p38_p3  ;;  %p117_p9 = scmp.lt.s32.totalorder %s962_s17, 5 }
   0xe   : > { %p1071_p10 = por %p104_p6, %p32_p1  ;;  %s129_s28 = sshll.u32 %s1278_s1, 4  ;;  %s130_s28 = int_to_ptr.hbm [resolvable:$true] %s129_s28 }
   0xf   : > { %p1075_p11 = pnand %p675_p7, %p117_p9  ;;  %s996_s29 = smov [#allocation5]  }
  0x10   : > { %s131_s30 = sshll.u32 %s996_s29, 4  ;;  %p677_p0 = scmp.ge.s32.totalorder %s962_s17, 4  ;;  %s132_s30 = int_to_ptr.vmem [resolvable:$true] %s131_s30 }
  0x11   : > { %p707_p12 = pneg %p1075_p11 }
  0x12   : > { %141 = sbr.rel (%p677_p0) target bundleno = 65 (0x41), region = 24 }
  0x13   : > { %p708_p13 = pnand %p707_p12, %p1281_p5 }
  0x15   : > { %710 = dma.hbm_to_vmem [thread:$0]  (!%p708_p13), %s130_s28, 48, %s132_s30, [#allocation6]  }
  0x17   : > { %144 = sbr.rel (!%p1057_p4) target bundleno = 65 (0x41), region = 28  ;;  %s145_s4 = sand.u32 (%p1057_p4), 1, %s958_s16  }
  0x18   : > { %s150_s5 = smul.u32 (%p1057_p4), 10, %s962_s17  ;;  %s1091_s11 = scalar_lea.sflag (%p1057_p4), [#allocation4], %s145_s4 }
  0x19   : > { %s698_s6 = smul.u32 (%p1057_p4), 240, %s145_s4 }
  0x1a   : > { %s151_s7 = ssub.s32 (%p1057_p4), 38, %s150_s5 }
  0x1b   : > { %p152_p1 = scmp.lt.s32.totalorder (%p1057_p4), %s151_s7, 10  ;;  %s149_s12 = scalar_lea.vmem (%p1057_p4), [#allocation3], %s698_s6 }
  0x1d   : > { %s1298_s7 = smov (!%p152_p1, %s151_s7), 10 }
  0x1e   : > { %s679_s8 = smul.u32 24, %s1298_s7 }
  0x20   : > { %s156_s9 = ssub.s32 240, %s679_s8 }
  0x21   : > { %s157_s10 = sshll.u32 %s156_s9, 4 }
  0x22   : > { %158 = vsyncadd %s1091_s11, %s157_s10  ;;  %p1094_p2 = scmp.ne.s32.totalorder %s679_s8, 0  ;;  %s712_s14 = smul.u32 240, %s962_s17 }
  0x23   : > { %s1099_s19 = sshll.u32 %s149_s12, 4  ;;  %s1101_s20 = smul.u32 384, %s1298_s7  ;;  %s167_s19 = int_to_ptr.vmem [resolvable:$true] %s1099_s19 }
  0x24   : > { %s162_s27 = scalar_lea.hbm %s1277_s0, %s712_s14  ;;  %s864_s8 = scalar_lea.hbm %s1277_s0, 912 }
  0x25   : > { %s164_s28 = sshll.u32 %s162_s27, 4  ;;  %s855_s17 = sshrl.u32 %s1101_s20, 4  ;;  %s1107_s28 = int_to_ptr.hbm [resolvable:$true] %s164_s28 }
  0x26   : > { %s853_s29 = sshra.s32 %s1107_s28, 4  ;;  %s891_s30 = sshll.u32 %s855_s17, 4  ;;  %s854_s29 = int_to_ptr.hbm [resolvable:$true] %s853_s29 }
  0x27   : > { %p857_p3 = scmp.ne.s32.totalorder %s891_s30, %s1101_s20  ;;  %s858_s4 = sadd.s32 1, %s855_s17 }
  0x28   : > { %p865_p9 = scmp.lt.s32.totalorder %s854_s29, %s1277_s0 }
  0x29   : > { %s1300_s4 = smov (!%p857_p3, %s858_s4), %s855_s17 }
  0x2a   : > { %s860_s5 = scalar_lea.hbm %s854_s29, %s1300_s4 }
  0x2b   : > { %p861_p4 = scmp.ne.s32.totalorder %s854_s29, %s860_s5  ;;  %p866_p12 = scmp.lt.s32.totalorder %s864_s8, %s860_s5 }
  0x2d   : > { %p862_p6 = pnand %p861_p4, %p1094_p2  ;;  %p867_p13 = por %p866_p12, %p865_p9 }
  0x2f   : > { %p863_p7 = pneg %p862_p6 }
  0x31   : > { %p868_p0 = pnand %p867_p13, %p863_p7 }
  0x33   : > { %871 = shalt.err (!%p868_p0)
}
  0x34   : > { %s872_s12 = sshra.s32 %s167_s19, 4  ;;  %s997_s22 = smov [#allocation3]   ;;  %s873_s12 = int_to_ptr.vmem [resolvable:$true] %s872_s12 }
  0x35   : > { %s879_s14 = scalar_lea.vmem %s873_s12, %s1300_s4  ;;  %s883_s26 = scalar_lea.vmem %s997_s22, 480 }
  0x36   : > { %p880_p1 = scmp.ne.s32.totalorder %s873_s12, %s879_s14  ;;  %p885_p6 = scmp.lt.s32.totalorder %s883_s26, %s879_s14 }
  0x38   : > { %p881_p3 = pnand %p880_p1, %p1094_p2 }
  0x3a   : > { %p882_p4 = pneg %p881_p3 }
  0x3c   : > { %p887_p5 = pnand %p885_p6, %p882_p4 }
  0x3e   : > { %890 = shalt.err (!%p887_p5)
}
  0x3f   : > { %s998_s27 = smov 384   ;;  %s999_s29 = smov 24  }
  0x40   : > { %172 = dma.hbm_to_vmem [thread:$0]  (%p1094_p2), %s1107_s28, %s1101_s20, %s167_s19, %s1091_s11, %s998_s27, %s998_s27, %s999_s29  }
  0x41 PF: > { %178 = sbr.rel (%p1075_p11) target bundleno = 309 (0x135), region = 32  ;;  %s1134_s17 = sand.u32 (!%p1075_p11), 1, %s954_s15  }
  0x42   : > { %s700_s30 = smul.u32 (!%p1075_p11), 240, %s1134_s17  ;;  %s181_s4 = scalar_lea.sflag (!%p1075_p11), [#allocation4], %s1134_s17 }
  0x44   : > { %s1138_s5 = scalar_lea.vmem (!%p1075_p11), [#allocation3], %s700_s30 }
  0x46   : > { %941 = dma.done.wait (%p1066_p8), %s181_s4, 3840  }
  0x47   : > { %943 = vsyncadd (%p1066_p8), %s181_s4, 4294963456  ;;  %p1287_p5 = scmp.eq.s32.totalorder %s1042_s2, 0 }
  0x49   : > { %945 = dma.done.wait (%p1287_p5), [#allocation6], 48   ;;  %p1288_p11 = pmov %p1287_p5 }
  0x4a   : > { %v227_v0 = vld [vmem:[%s1138_s5 + $0x60] sm:$0xff]  ;;  %v261_v2 = vld [vmem:[%s1138_s5 + $0x68] sm:$0xff]  ;;  %v225_v5 = vld [vmem:[%s1138_s5 + $0x30] sm:$0xff]  ;;  %vm335_vm0 = vcmask 523264   ;;  %s376_s23 = sld [smem:[#allocation2]]  ;;  %s701_s25 = smul.u32 80, %s1134_s17 }
  0x4b   : > { %947 = vsyncadd (%p1288_p11), [#allocation6], 4294967248  ;;  %v814_v1 = vld [vmem:[#allocation5] ss:$0 sm:$0xff]  ;;  %v815_v3 = vld [vmem:[#allocation5 + $0x1] ss:$0 sm:$0xff] }
  0x4c   : > { %v241_v4 = vmul.f32 %v814_v1, %v227_v0  ;;  %v259_v6 = vld [vmem:[%s1138_s5 + $0x38] sm:$0xff]  ;;  %v223_v7 = vld [vmem:[%s1138_s5] sm:$0xff]  ;;  %v275_v8 = vmul.f32 %v815_v3, %v261_v2  ;;  %v239_v9 = vmul.f32 %v814_v1, %v225_v5  ;;  %v257_v12 = vld [vmem:[%s1138_s5 + $0x8] sm:$0xff]  ;;  %vm388_vm1 = vcmask 7168   ;;  %s1189_s11 = scalar_lea.vmem [#allocation7], %s701_s25   ;;  %s406_s13 = smul.u32 (%p1071_p10), 10, %s1042_s2 }
  0x4d   : > { %v273_v10 = vmul.f32 %v815_v3, %v259_v6  ;;  %v237_v11 = vmul.f32 %v814_v1, %v223_v7  ;;  %v228_v13 = vld [vmem:[%s1138_s5 + $0x78] sm:$0xff]  ;;  %v271_v14 = vmul.f32 %v815_v3, %v257_v12  ;;  %v262_v15 = vld [vmem:[%s1138_s5 + $0x80] sm:$0xff]  ;;  %v226_v16 = vld [vmem:[%s1138_s5 + $0x48] sm:$0xff]  ;;  %s697_s19 = smul.u32 (%p1071_p10), 80, %s1042_s2 }
  0x4e   : > { %v260_v17 = vld [vmem:[%s1138_s5 + $0x50] sm:$0xff]  ;;  %v285_v18 = vadd.f32 %v275_v8, %v241_v4  ;;  %v224_v20 = vld [vmem:[%s1138_s5 + $0x18] sm:$0xff]  ;;  %v258_v21 = vld [vmem:[%s1138_s5 + $0x20] sm:$0xff]  ;;  %v242_v23 = vmul.f32 %v814_v1, %v228_v13  ;;  %v276_v24 = vmul.f32 %v815_v3, %v262_v15  ;;  %v240_v25 = vmul.f32 %v814_v1, %v226_v16  ;;  %s407_s20 = ssub.s32 (%p1071_p10), 38, %s406_s13 }
  0x4f   : > { %v283_v19 = vadd.f32 %v273_v10, %v239_v9  ;;  %v281_v22 = vadd.f32 %v271_v14, %v237_v11  ;;  %v274_v26 = vmul.f32 %v815_v3, %v260_v17  ;;  %v238_v27 = vmul.f32 %v814_v1, %v224_v20  ;;  %v231_v31 = vld [vmem:[%s1138_s5 + $0xc0] sm:$0xff]  ;;  %v265_v33 = vld [vmem:[%s1138_s5 + $0xc8] sm:$0xff]  ;;  %v264_v35 = vld [vmem:[%s1138_s5 + $0xb0] sm:$0xff]  ;;  %p408_p8 = scmp.lt.s32.totalorder (%p1071_p10), %s407_s20, 10  ;;  %s1218_s7 = scalar_lea.vmem (%p1071_p10), %s1280_s3, %s697_s19  }
  0x50   : > { %299 = vadd.xlane.f32.xlu2 %v285_v18  ;;  %v272_v28 = vmul.f32 %v815_v3, %v258_v21  ;;  %v286_v29 = vadd.f32 %v276_v24, %v242_v23  ;;  %v230_v34 = vld [vmem:[%s1138_s5 + $0xa8] sm:$0xff]  ;;  %v229_v36 = vld [vmem:[%s1138_s5 + $0x90] sm:$0xff]  ;;  %v263_v37 = vld [vmem:[%s1138_s5 + $0x98] sm:$0xff]  ;;  %v245_v38 = vmul.f32 %v814_v1, %v231_v31  ;;  %v279_v39 = vmul.f32 %v815_v3, %v265_v33 }
  0x51   : > { %295 = vadd.xlane.f32.xlu1 %v283_v19  ;;  %291 = vadd.xlane.f32.xlu0 %v281_v22  ;;  %v284_v30 = vadd.f32 %v274_v26, %v240_v25  ;;  %v244_v40 = vmul.f32 %v814_v1, %v230_v34  ;;  %v278_v41 = vmul.f32 %v815_v3, %v264_v35  ;;  %v312_v47 = vld [vmem:[%s1138_s5 + $0x28] sm:$0xff]  ;;  %v816_v48 = vld [vmem:[#allocation5 + $0x2] ss:$0 sm:$0xff]  ;;  %v232_v50 = vld [vmem:[%s1138_s5 + $0xd8] sm:$0xff] }
  0x52   : > { %v282_v32 = vadd.f32 %v272_v28, %v238_v27  ;;  %v243_v42 = vmul.f32 %v814_v1, %v229_v36  ;;  %v277_v43 = vmul.f32 %v815_v3, %v263_v37  ;;  %v289_v44 = vadd.f32 %v279_v39, %v245_v38  ;;  %v311_v49 = vld [vmem:[%s1138_s5 + $0x10] sm:$0xff]  ;;  %v266_v51 = vld [vmem:[%s1138_s5 + $0xe0] sm:$0xff]  ;;  %v314_v60 = vld [vmem:[%s1138_s5 + $0x58] sm:$0xff] }
  0x53   : > { %v288_v45 = vadd.f32 %v278_v41, %v244_v40  ;;  %v326_v52 = vmul.f32 %v816_v48, %v312_v47  ;;  %v325_v53 = vmul.f32 %v816_v48, %v311_v49  ;;  %v246_v54 = vmul.f32 %v814_v1, %v232_v50  ;;  %v315_v59 = vld [vmem:[%s1138_s5 + $0x70] sm:$0xff]  ;;  %v313_v61 = vld [vmem:[%s1138_s5 + $0x40] sm:$0xff]  ;;  %v318_v4 = vld [vmem:[%s1138_s5 + $0xb8] sm:$0xff] }
  0x54   : > { %v287_v46 = vadd.f32 %v277_v43, %v243_v42  ;;  %v280_v55 = vmul.f32 %v815_v3, %v266_v51  ;;  %v329_v62 = vmul.f32 %v816_v48, %v315_v59  ;;  %v328_v63 = vmul.f32 %v816_v48, %v314_v60  ;;  %v317_v5 = vld [vmem:[%s1138_s5 + $0xa0] sm:$0xff]  ;;  %v316_v6 = vld [vmem:[%s1138_s5 + $0x88] sm:$0xff]  ;;  %v319_v14 = vld [vmem:[%s1138_s5 + $0xd0] sm:$0xff] }
  0x55   : > { %v339_v56 = vsel %vm335_vm0, %v326_v52, 0.0  ;;  %v336_v57 = vsel %vm335_vm0, %v325_v53, 0.0  ;;  %v327_v0 = vmul.f32 %v816_v48, %v313_v61  ;;  %v332_v7 = vmul.f32 %v816_v48, %v318_v4  ;;  %v320_v13 = vld [vmem:[%s1138_s5 + $0xe8] sm:$0xff] }
  0x56   : > { %v290_v58 = vadd.f32 %v280_v55, %v246_v54  ;;  %v348_v1 = vsel %vm335_vm0, %v329_v62, 0.0  ;;  %v345_v2 = vsel %vm335_vm0, %v328_v63, 0.0  ;;  %v331_v8 = vmul.f32 %v816_v48, %v317_v5 }
  0x57   : > { %v342_v3 = vsel %vm335_vm0, %v327_v0, 0.0  ;;  %v330_v9 = vmul.f32 %v816_v48, %v316_v6  ;;  %v357_v10 = vsel %vm335_vm0, %v332_v7, 0.0  ;;  %v334_v15 = vmul.f32 %v816_v48, %v320_v13 }
  0x58   : > { %301 = vadd.xlane.f32.xlu2 %v286_v29  ;;  %v354_v11 = vsel %vm335_vm0, %v331_v8, 0.0  ;;  %v333_v16 = vmul.f32 %v816_v48, %v319_v14  ;;  %v377_v28 = vstv %s376_s23 }
  0x59   : > { %297 = vadd.xlane.f32.xlu1 %v284_v30  ;;  %293 = vadd.xlane.f32.xlu0 %v282_v32  ;;  %v351_v12 = vsel %vm335_vm0, %v330_v9, 0.0  ;;  %v363_v17 = vsel %vm335_vm0, %v334_v15, 0.0 }
  0x5a   : > { %v360_v18 = vsel %vm335_vm0, %v333_v16, 0.0 }
  0x60   : > { %307 = vadd.xlane.f32.xlu2 %v289_v44 }
  0x61   : > { %305 = vadd.xlane.f32.xlu1 %v288_v45  ;;  %303 = vadd.xlane.f32.xlu0 %v287_v46 }
  0x68   : > { %340 = vadd.xlane.f32.xlu2 %v339_v56 }
  0x69   : > { %337 = vadd.xlane.f32.xlu1 %v336_v57  ;;  %309 = vadd.xlane.f32.xlu0 %v290_v58 }
  0x70   : > { %349 = vadd.xlane.f32.xlu2 %v348_v1 }
  0x71   : > { %346 = vadd.xlane.f32.xlu1 %v345_v2  ;;  %343 = vadd.xlane.f32.xlu0 %v342_v3 }
  0x78   : > { %358 = vadd.xlane.f32.xlu2 %v357_v10 }
  0x79   : > { %355 = vadd.xlane.f32.xlu1 %v354_v11  ;;  %352 = vadd.xlane.f32.xlu0 %v351_v12 }
  0x81   : > { %364 = vadd.xlane.f32.xlu1 %v363_v17  ;;  %361 = vadd.xlane.f32.xlu0 %v360_v18 }
  0xc3   : > { %v300_v19 = vpop.xlane.xlu2 %299 }
  0xc4   : > { %v296_v20 = vpop.xlane.xlu1 %295  ;;  %v292_v21 = vpop.xlane.xlu0 %291 }
  0xcb   : > { %v302_v22 = vpop.xlane.xlu2 %301 }
  0xcc   : > { %v298_v23 = vpop.xlane.xlu1 %297  ;;  %v294_v24 = vpop.xlane.xlu0 %293 }
  0xd3   : > { %v308_v25 = vpop.xlane.xlu2 %307 }
  0xd4   : > { %v306_v26 = vpop.xlane.xlu1 %305  ;;  %v304_v27 = vpop.xlane.xlu0 %303 }
  0xdb   : > { %v341_v29 = vpop.xlane.xlu2 %340 }
  0xdc   : > { %v338_v30 = vpop.xlane.xlu1 %337  ;;  %v367_v31 = vadd.f32 %v341_v29, %v294_v24  ;;  %v310_v33 = vpop.xlane.xlu0 %309 }
  0xdd   : > { %v366_v32 = vadd.f32 %v338_v30, %v292_v21 }
  0xde   : > { %v379_v34 = vadd.f32 %v377_v28, %v367_v31 }
  0xdf   : > { %v378_v35 = vadd.f32 %v377_v28, %v366_v32 }
  0xe0   : > { %390 = vst.msk [vmem:[%s1189_s11 + $0x8] sm:$0xff] %vm388_vm1, %v379_v34 }
  0xe1   : > { %389 = vst.msk [vmem:[%s1189_s11] sm:$0xff] %vm388_vm1, %v378_v35 }
  0xe3   : > { %v350_v36 = vpop.xlane.xlu2 %349 }
  0xe4   : > { %v347_v37 = vpop.xlane.xlu1 %346  ;;  %v370_v38 = vadd.f32 %v350_v36, %v300_v19  ;;  %v344_v40 = vpop.xlane.xlu0 %343 }
  0xe5   : > { %v369_v39 = vadd.f32 %v347_v37, %v298_v23  ;;  %v368_v41 = vadd.f32 %v344_v40, %v296_v20 }
  0xe6   : > { %v382_v42 = vadd.f32 %v377_v28, %v370_v38 }
  0xe7   : > { %v381_v43 = vadd.f32 %v377_v28, %v369_v39  ;;  %v380_v44 = vadd.f32 %v377_v28, %v368_v41 }
  0xe8   : > { %393 = vst.msk [vmem:[%s1189_s11 + $0x20] sm:$0xff] %vm388_vm1, %v382_v42 }
  0xe9   : > { %392 = vst.msk [vmem:[%s1189_s11 + $0x18] sm:$0xff] %vm388_vm1, %v381_v43 }
  0xea   : > { %391 = vst.msk [vmem:[%s1189_s11 + $0x10] sm:$0xff] %vm388_vm1, %v380_v44 }
  0xeb   : > { %v359_v45 = vpop.xlane.xlu2 %358 }
  0xec   : > { %v356_v46 = vpop.xlane.xlu1 %355  ;;  %v373_v47 = vadd.f32 %v359_v45, %v306_v26  ;;  %v353_v49 = vpop.xlane.xlu0 %352 }
  0xed   : > { %v372_v48 = vadd.f32 %v356_v46, %v304_v27  ;;  %v371_v50 = vadd.f32 %v353_v49, %v302_v22 }
  0xee   : > { %v385_v51 = vadd.f32 %v377_v28, %v373_v47 }
  0xef   : > { %v384_v52 = vadd.f32 %v377_v28, %v372_v48  ;;  %v383_v53 = vadd.f32 %v377_v28, %v371_v50 }
  0xf0   : > { %396 = vst.msk [vmem:[%s1189_s11 + $0x38] sm:$0xff] %vm388_vm1, %v385_v51 }
  0xf1   : > { %395 = vst.msk [vmem:[%s1189_s11 + $0x30] sm:$0xff] %vm388_vm1, %v384_v52 }
  0xf2   : > { %394 = vst.msk [vmem:[%s1189_s11 + $0x28] sm:$0xff] %vm388_vm1, %v383_v53 }
  0xf4   : > { %v365_v54 = vpop.xlane.xlu1 %364  ;;  %v362_v56 = vpop.xlane.xlu0 %361 }
  0xf5   : > { %v375_v55 = vadd.f32 %v365_v54, %v310_v33  ;;  %v374_v57 = vadd.f32 %v362_v56, %v308_v25 }
  0xf6   : > { %405 = sbr.rel (!%p1071_p10) target bundleno = 309 (0x135), region = 44 }
  0xf7   : > { %v387_v58 = vadd.f32 %v377_v28, %v375_v55  ;;  %v386_v59 = vadd.f32 %v377_v28, %v374_v57 }
  0xf9   : > { %398 = vst.msk [vmem:[%s1189_s11 + $0x48] sm:$0xff] %vm388_vm1, %v387_v58 }
  0xfa   : > { %397 = vst.msk [vmem:[%s1189_s11 + $0x40] sm:$0xff] %vm388_vm1, %v386_v59 }
  0xfb   : > { %s1302_s20 = smov (!%p408_p8, %s407_s20), 10 }
  0xfc   : > { %s685_s8 = sshll.u32 %s1302_s20, 3 }
  0xfd   : > { %p688_p2 = scmp.eq.s32.totalorder %s685_s8, 0 }
  0xfe   : > { %817 = sdivrem.u32 (!%p688_p2), %s1302_s20, 10 }
  0xff   : > { %416 = sbr.rel (%p688_p2) target bundleno = 309 (0x135), region = 48 }
 0x107   : > { %s1224_s24 = spop.drf %817 }
 0x108   : > { %s819_s9 = spop.drf %817  ;;  %p689_p10 = scmp.le.s32.totalorder %s1224_s24, 0 }
 0x109   : > { %s1289_s2 = smov (!%p689_p10), %s1218_s7  ;;  %s1290_s10 = smov (!%p689_p10), %s1189_s11 }
 0x10a   : > { %618 = sbr.rel (%p689_p10) target bundleno = 283 (0x11b), region = 130  ;;  %s1233_s12 = smov (!%p689_p10), 0  }
 0x10b   : > { %s1235_s14 = smov (!%p689_p10), 0  }
 0x10f LB: >> { %v499_v60 = vld [vmem:[%s970_s10] sm:$0xff]  ;;  %v501_v61 = vld [vmem:[%s970_s10 + $0x8] sm:$0xff]  ;;  %v503_v62 = vld [vmem:[%s970_s10 + $0x10] sm:$0xff]  ;;  %s519_s22 = sadd.s32 1, %s974_s12  ;;  %s493_s14 = sadd.s32 1, %s978_s14   ;;  %s978_s14 = sphi %s1235_s14, %s493_s14   ;;  %s974_s12 = sphi %s1233_s12, %s1292_s12   ;;  %s970_s10 = sphi %s1290_s10, %s524_s10   ;;  %s966_s2 = sphi %s1289_s2, %s1291_s2  }
 0x110   : >> { %500 = vst [vmem:[%s966_s2] sm:$0xff] %v499_v60  ;;  %v505_v63 = vld [vmem:[%s970_s10 + $0x18] sm:$0xff]  ;;  %p520_p7 = scmp.ge.s32.totalorder %s519_s22, %s1224_s24  ;;  %v507_v0 = vld [vmem:[%s970_s10 + $0x20] sm:$0xff]  ;;  %v509_v1 = vld [vmem:[%s970_s10 + $0x28] sm:$0xff]  ;;  %p492_p9 = scmp.ge.s32.totalorder %s493_s14, %s1224_s24 }
 0x111   : >> { %502 = vst [vmem:[%s966_s2 + $0x8] sm:$0xff] %v501_v61  ;;  %v511_v2 = vld [vmem:[%s970_s10 + $0x30] sm:$0xff]  ;;  %v513_v3 = vld [vmem:[%s970_s10 + $0x38] sm:$0xff]  ;;  %v515_v4 = vld [vmem:[%s970_s10 + $0x40] sm:$0xff] }
 0x112   : >> { %504 = vst [vmem:[%s966_s2 + $0x10] sm:$0xff] %v503_v62  ;;  %s1304_s22 = smov (%p520_p7, %s519_s22), 0  ;;  %v517_v5 = vld [vmem:[%s970_s10 + $0x48] sm:$0xff] }
 0x113   : >> { %506 = vst [vmem:[%s966_s2 + $0x18] sm:$0xff] %v505_v63  ;;  %s522_s26 = smul.u32 80, %s1304_s22  ;;  %s1292_s12 = smov %s1304_s22 }
 0x114   : >> { %508 = vst [vmem:[%s966_s2 + $0x20] sm:$0xff] %v507_v0 }
 0x115   : >> { %510 = vst [vmem:[%s966_s2 + $0x28] sm:$0xff] %v509_v1  ;;  %s524_s10 = scalar_lea.vmem %s1189_s11, %s522_s26 [#allocation7]   ;;  %s525_s27 = scalar_lea.vmem %s1218_s7, %s522_s26  }
 0x116   : >> { %512 = vst [vmem:[%s966_s2 + $0x30] sm:$0xff] %v511_v2  ;;  %495 = sbr.rel (!%p492_p9) target bundleno = 271 (0x10f), region = 136 }
 0x117   : >> { %514 = vst [vmem:[%s966_s2 + $0x38] sm:$0xff] %v513_v3 }
 0x118   : >> { %516 = vst [vmem:[%s966_s2 + $0x40] sm:$0xff] %v515_v4 }
 0x119   : >> { %518 = vst [vmem:[%s966_s2 + $0x48] sm:$0xff] %v517_v5  ;;  %s1291_s2 = smov %s525_s27 }
 0x11b PF: > { %820 = sdivrem.u32 %s1302_s20, 10 }
 0x11c   : > { %s690_s29 = smul.u32 80, %s1224_s24 }
 0x11e   : > { %s1259_s17 = scalar_lea.vmem %s1189_s11, %s690_s29 [#allocation7]   ;;  %s532_s30 = scalar_lea.vmem %s1218_s7, %s690_s29  }
 0x124   : > { %s821_s4 = spop.drf %820 }
 0x125   : > { %s822_s5 = spop.drf %820 }
 0x126   : > { %p692_p12 = scmp.le.s32.totalorder %s822_s5, 0 }
 0x127   : > { %s980_s23 = smov (!%p692_p12), %s532_s30   ;;  %s984_s25 = smov (!%p692_p12), %s1259_s17  }
 0x128   : > { %632 = sbr.rel (%p692_p12) target bundleno = 309 (0x135), region = 141  ;;  %s988_s13 = smov (!%p692_p12), 0  }
 0x129   : > { %s992_s19 = smov (!%p692_p12), 0  }
 0x12d LB: >> { %v542_v6 = vld [vmem:[%s986_s25] sm:$0xff]  ;;  %s544_s11 = sadd.s32 1, %s990_s13  ;;  %s536_s19 = sadd.s32 1, %s994_s19   ;;  %s994_s19 = sphi %s992_s19, %s536_s19   ;;  %s990_s13 = sphi %s988_s13, %s989_s13   ;;  %s986_s25 = sphi %s984_s25, %s549_s25   ;;  %s982_s23 = sphi %s980_s23, %s550_s23  }
 0x12e   : >> { %543 = vst [vmem:[%s982_s23] sm:$0xff] %v542_v6  ;;  %p545_p13 = scmp.ge.s32.totalorder %s544_s11, %s822_s5  ;;  %p535_p0 = scmp.ge.s32.totalorder %s536_s19, %s822_s5 }
 0x130   : >> { %s1306_s11 = smov (%p545_p13, %s544_s11), 0  ;;  %538 = sbr.rel (!%p535_p0) target bundleno = 301 (0x12d), region = 147 }
 0x131   : >> { %s693_s20 = sshll.u32 %s1306_s11, 3  ;;  %s989_s13 = smov %s1306_s11  }
 0x132   : >> { %s549_s25 = scalar_lea.vmem %s1259_s17, %s693_s20 [#allocation7]   ;;  %s550_s23 = scalar_lea.vmem %s532_s30, %s693_s20  }
 0x135 PF: > { %p15_p1 = scmp.ge.s32.totalorder %s1045_s18, 6   ;;  %s1293_s14 = smov %s954_s15 }
 0x136   : > { %s1294_s15 = smov %s958_s16  ;;  %s1295_s16 = smov %s1055_s21 }
 0x137   : > { %s1296_s17 = smov %s1045_s18  ;;  %17 = sbr.rel (!%p15_p1) target bundleno = 6 (0x6), region = 158 }
 0x13c   :  { %566 = vsyncpa [#allocation4], 1 }
 0x13d   :  { %568 = vsyncpa [#allocation4 + $0x1], 1 }
 0x13e   :  { %569 = vsyncpa [#allocation6], 1 }

</bundles_post_ra>
